<compile_context>
chip_gen: v7x
topology: tpu7x:2x2x1
jax: 0.10.0
libtpu: 0.0.40
codegen_flags: <defaults>
</compile_context>

<pallas_src>
import functools

import jax
import jax.numpy as jnp
from jax.experimental import pallas as pl
from jax.experimental.pallas import tpu as pltpu


def _round_up(x: int, m: int) -> int:
    return (x + m - 1) // m * m


def _sublane(dtype) -> int:
    # Rows per vreg: f32 -> 8, bf16 -> 16, int8/fp8 -> 32.
    itemsize = jnp.dtype(dtype).itemsize
    return max(8, 8 * (4 // max(1, itemsize)))


def _pick_tile(dim: int, max_tile: int, align: int) -> int:
    """Pick a tile (multiple of `align`, <= max_tile) minimizing pad waste.

    If the aligned extent fits in one tile, use it directly (no grid steps,
    no padding beyond alignment).  Otherwise prefer an exact divisor of the
    aligned extent that stays >= max_tile/2; fall back to max_tile.
    """
    dim_aligned = _round_up(dim, align)
    max_tile = max(align, (max_tile // align) * align)
    if dim_aligned <= max_tile:
        return dim_aligned
    t = max_tile
    while 2 * t >= max_tile:
        if dim_aligned % t == 0:
            return t
        t -= align
    return max_tile


def _mm_kernel_inplace(a_ref, b_ref, o_ref, *, acc_dtype):
    # Output block index is constant along the K grid axis, so o_ref stays
    # resident in VMEM across the whole K sweep -> accumulate into it directly.
    p = jnp.dot(a_ref[...], b_ref[...], preferred_element_type=acc_dtype)

    @pl.when(pl.program_id(2) == 0)
    def _first():
        o_ref[...] = p

    @pl.when(pl.program_id(2) != 0)
    def _rest():
        o_ref[...] += p


def _mm_kernel_scratch(a_ref, b_ref, o_ref, acc_ref, *, acc_dtype):
    # Used only when the accumulation dtype differs from the output dtype.
    @pl.when(pl.program_id(2) == 0)
    def _init():
        acc_ref[...] = jnp.zeros_like(acc_ref)

    acc_ref[...] += jnp.dot(a_ref[...], b_ref[...],
                            preferred_element_type=acc_dtype)

    @pl.when(pl.program_id(2) == pl.num_programs(2) - 1)
    def _finalize():
        o_ref[...] = acc_ref[...].astype(o_ref.dtype)


def pallas_mm(a0: jax.Array, a1: jax.Array, *, tm: int = 512, tn: int = 512,
              tk: int = 512, core_parallel: bool = False) -> jax.Array:
    """torch.mm equivalent: (M, K) @ (K, N) -> (M, N)."""
    M, K = a0.shape
    K2, N = a1.shape
    assert K == K2, "inner dimensions must match"
    out_dtype = jnp.result_type(a0.dtype, a1.dtype)
    acc_dtype = (jnp.int32 if jnp.issubdtype(out_dtype, jnp.integer)
                 else jnp.float32)

    # Alignment: tm is a sublane dim of a0 and the output (dtype-dependent);
    # tk / tn are lane dims (128), which also covers a1's packed K sublanes.
    m_align = max(_sublane(a0.dtype), _sublane(out_dtype))
    tm = _pick_tile(M, tm, m_align)
    tn = _pick_tile(N, tn, 128)
    tk = _pick_tile(K, tk, 128)

    # Zero-pad only what alignment / tiling actually requires (zeros along K
    # contribute nothing to the accumulation).
    Mp, Kp, Np = _round_up(M, tm), _round_up(K, tk), _round_up(N, tn)
    if (Mp, Kp) != (M, K):
        a0 = jnp.pad(a0, ((0, Mp - M), (0, Kp - K)))
    if (Kp, Np) != (K, N):
        a1 = jnp.pad(a1, ((0, Kp - K), (0, Np - N)))

    grid = (Mp // tm, Np // tn, Kp // tk)

    inplace = jnp.dtype(out_dtype) == jnp.dtype(acc_dtype)
    if inplace:
        kernel = functools.partial(_mm_kernel_inplace, acc_dtype=acc_dtype)
        scratch_shapes = []
    else:
        kernel = functools.partial(_mm_kernel_scratch, acc_dtype=acc_dtype)
        scratch_shapes = [pltpu.VMEM((tm, tn), acc_dtype)]

    it_a = jnp.dtype(a0.dtype).itemsize
    it_b = jnp.dtype(a1.dtype).itemsize
    it_o = jnp.dtype(out_dtype).itemsize

    # Truthful tiled traffic: A re-read per N-tile, B re-read per M-tile.
    cost = pl.CostEstimate(
        flops=2 * Mp * Np * Kp,
        transcendentals=0,
        bytes_accessed=(Mp * Kp * it_a * grid[1]
                        + Kp * Np * it_b * grid[0]
                        + Mp * Np * it_o),
    )

    # Double-buffered inputs + output (+ scratch).  Only raise the scoped
    # VMEM limit when the working set exceeds the most conservative default
    # (v5e: 16 MiB); cap at v7x's 64 MiB physical VMEM.
    vmem_est = 2 * (tm * tk * it_a + tk * tn * it_b + tm * tn * it_o)
    if not inplace:
        vmem_est += tm * tn * jnp.dtype(acc_dtype).itemsize
    vmem_limit = None
    if vmem_est > 12 * 1024 * 1024:
        vmem_limit = min(int(vmem_est * 3 // 2) + (4 << 20), 64 << 20)

    # TODO(synk): set core_parallel=True on v7x to shard the M axis across
    # both TensorCores (pltpu.CORE_PARALLEL); plain "parallel" is kept as the
    # default so single-TC chips compile unchanged.
    m_sem = pltpu.CORE_PARALLEL if core_parallel else "parallel"

    out_padded = pl.pallas_call(
        kernel,
        out_shape=jax.ShapeDtypeStruct((Mp, Np), out_dtype),
        grid_spec=pltpu.PrefetchScalarGridSpec(
            num_scalar_prefetch=0,
            grid=grid,
            in_specs=[
                pl.BlockSpec((tm, tk), lambda i, j, k: (i, k)),
                pl.BlockSpec((tk, tn), lambda i, j, k: (k, j)),
            ],
            out_specs=pl.BlockSpec((tm, tn), lambda i, j, k: (i, j)),
            scratch_shapes=scratch_shapes,
        ),
        compiler_params=pltpu.CompilerParams(
            dimension_semantics=(m_sem, "parallel", "arbitrary"),
            vmem_limit_bytes=vmem_limit,
        ),
        cost_estimate=cost,
    )(a0, a1)

    if (Mp, Np) != (M, N):
        out_padded = out_padded[:M, :N]
    return out_padded


if __name__ == "__main__":
    key = jax.random.PRNGKey(0)
    k0, k1, k2, k3, k4, k5 = jax.random.split(key, 6)

    # Case 1: small torch.mm-style shapes (exercises the padding + single-tile
    # path: K 32->128, N 16->128).
    M, K, N = 8, 32, 16
    a0 = jax.random.normal(k0, (M, K), dtype=jnp.float32)
    a1 = jax.random.normal(k1, (K, N), dtype=jnp.float32)
    out = pallas_mm(a0, a1)
    jax.block_until_ready(out)
    ref = a0 @ a1
    assert out.shape == (M, N)
    assert jnp.allclose(out, ref, atol=1e-5, rtol=1e-5)

    # Case 2: non-power-of-two shapes; tiles clamp to the aligned extents
    # (tm=192, tk=384, tn=384) -> no padding at all, single grid step.
    M2, K2, N2 = 192, 320, 384
    b0 = jax.random.normal(k2, (M2, K2), dtype=jnp.float32)
    b1 = jax.random.normal(k3, (K2, N2), dtype=jnp.float32)
    out2 = pallas_mm(b0, b1)
    jax.block_until_ready(out2)
    ref2 = b0 @ b1
    assert out2.shape == (M2, N2)
    assert jnp.allclose(out2, ref2, atol=1e-4, rtol=1e-4)

    # Case 3: multi-tile (M, N, K) grid with in-place K accumulation into the
    # resident output block (no accumulator scratch).
    M3, K3, N3 = 384, 1024, 640
    c0 = jax.random.normal(k4, (M3, K3), dtype=jnp.float32)
    c1 = jax.random.normal(k5, (K3, N3), dtype=jnp.float32)
    out3 = pallas_mm(c0, c1, tm=128, tn=256, tk=256)
    jax.block_until_ready(out3)
    ref3 = c0 @ c1
    assert out3.shape == (M3, N3)
    assert jnp.allclose(out3, ref3, atol=2e-3, rtol=2e-3)

    print("KERNEL_OK")
</pallas_src>

<mosaic_0001>
module attributes {stable_mosaic.version = 11 : i64} {
  func.func @_mm_kernel_inplace(%arg0: i32, %arg1: i32, %arg2: i32, %arg3: memref<8x128xf32, #tpu.memory_space<vmem>>, %arg4: memref<128x128xf32, #tpu.memory_space<vmem>>, %arg5: memref<8x128xf32, #tpu.memory_space<vmem>>) attributes {dimension_semantics = [#tpu.dimension_semantics<parallel>, #tpu.dimension_semantics<parallel>, #tpu.dimension_semantics<arbitrary>], iteration_bounds = array<i64: 1, 1, 1>, scalar_prefetch = 0 : i64, scratch_operands = 0 : i64, tpu.core_type = #tpu.core_type<tc>, window_params = [{transform_indices = @transform_0, window_bounds = array<i64: 8, 128>}, {transform_indices = @transform_1, window_bounds = array<i64: 128, 128>}, {transform_indices = @transform_2, window_bounds = array<i64: 8, 128>}]} {
    %c0 = arith.constant 0 : index
    %c0_0 = arith.constant 0 : index
    %0 = vector.load %arg3[%c0, %c0_0] : memref<8x128xf32, #tpu.memory_space<vmem>>, vector<8x128xf32>
    %c0_1 = arith.constant 0 : index
    %c0_2 = arith.constant 0 : index
    %1 = vector.load %arg4[%c0_1, %c0_2] : memref<128x128xf32, #tpu.memory_space<vmem>>, vector<128x128xf32>
    %cst = arith.constant dense<0.000000e+00> : vector<8x128xf32>
    %2 = tpu.matmul %0, %1, %cst {dimension_numbers = #tpu.dot_dimension_numbers<[1], [0], [0], [1], [0, 0, 1, 1], [], []>} : vector<8x128xf32>, vector<128x128xf32>, vector<8x128xf32> -> vector<8x128xf32>
    %c0_i32 = arith.constant 0 : i32
    %3 = arith.cmpi eq, %arg2, %c0_i32 : i32
    %4 = arith.extui %3 : i1 to i32
    %c0_i32_3 = arith.constant 0 : i32
    %5 = arith.cmpi ne, %4, %c0_i32_3 : i32
    scf.if %5 {
      %c0_6 = arith.constant 0 : index
      %c0_7 = arith.constant 0 : index
      %9 = vector.load %arg5[%c0_6, %c0_7] : memref<8x128xf32, #tpu.memory_space<vmem>>, vector<8x128xf32>
      tpu.vector_store %arg5[%c0_6, %c0_7], %2 {strides = array<i32>} : memref<8x128xf32, #tpu.memory_space<vmem>>, vector<8x128xf32>,
    } else {
    }
    %c0_i32_4 = arith.constant 0 : i32
    %6 = arith.cmpi ne, %arg2, %c0_i32_4 : i32
    %7 = arith.extui %6 : i1 to i32
    %c0_i32_5 = arith.constant 0 : i32
    %8 = arith.cmpi ne, %7, %c0_i32_5 : i32
    scf.if %8 {
      %c0_6 = arith.constant 0 : index
      %c0_7 = arith.constant 0 : index
      %9 = vector.load %arg5[%c0_6, %c0_7] : memref<8x128xf32, #tpu.memory_space<vmem>>, vector<8x128xf32>
      %10 = arith.addf %9, %2 : vector<8x128xf32>
      %c0_8 = arith.constant 0 : index
      %c0_9 = arith.constant 0 : index
      %11 = vector.load %arg5[%c0_8, %c0_9] : memref<8x128xf32, #tpu.memory_space<vmem>>, vector<8x128xf32>
      tpu.vector_store %arg5[%c0_8, %c0_9], %10 {strides = array<i32>} : memref<8x128xf32, #tpu.memory_space<vmem>>, vector<8x128xf32>,
    } else {
    }
    return
  }
  func.func @transform_0(%arg0: i32, %arg1: i32, %arg2: i32) -> (i32, i32) {
    %c0_i32 = arith.constant 0 : i32
    return %arg0, %arg2 : i32, i32
  }
  func.func @transform_1(%arg0: i32, %arg1: i32, %arg2: i32) -> (i32, i32) {
    %c0_i32 = arith.constant 0 : i32
    return %arg2, %arg1 : i32, i32
  }
  func.func @transform_2(%arg0: i32, %arg1: i32, %arg2: i32) -> (i32, i32) {
    %c0_i32 = arith.constant 0 : i32
    return %arg0, %arg1 : i32, i32
  }
}

</mosaic_0001>

<bundles_post_ra>
// kernel: tpu_custom_call.1
= control target key start
LH: loop header
LB: loop body
LE: loop exit
PB: predicated region body
PF: predicated region fallthrough
CT: control target
= control target key end

     0   :  { %7 = vsyncpa [#allocation3], 0  ;;  %s375_s0 = inlined_call_operand.hbm [shape: f32[8,128], index: 0, kind: input, shape index: {}]   ;;  %s376_s1 = inlined_call_operand.hbm [shape: f32[128,128], index: 1, kind: input, shape index: {}]   ;;  %s377_s2 = inlined_call_operand.hbm [shape: f32[8,128], index: 2, kind: output, shape index: {}]  }
   0x1   :  { %8 = vsyncpa [#allocation6], 0 }
   0x2   :  { %9 = vsyncpa [#allocation4], 0  ;;  %s309_s9 = smov [#allocation2]   ;;  %s310_s11 = smov [#allocation5]  }
   0x3   :  { %s16_s10 = sshll.u32 %s309_s9, 4  ;;  %s25_s12 = sshll.u32 %s310_s11, 4  ;;  %s17_s10 = int_to_ptr.vmem [resolvable:$true] %s16_s10  ;;  %s332_s12 = int_to_ptr.vmem [resolvable:$true] %s25_s12 }
   0x4   :  { %s237_s15 = scalar_lea.hbm %s375_s0, 128 }
   0x5   :  { %p238_p0 = scmp.ne.s32.totalorder %s375_s0, %s237_s15  ;;  %p241_p1 = scmp.lt.u32.totalorder %s237_s15, %s375_s0 }
   0x7   :  { %p243_p2 = pnand %p241_p1, %p238_p0 }
   0x9   :  { %246 = shalt.err (!%p243_p2)
}
   0xa   :  { %s247_s20 = scalar_lea.vmem %s17_s10, 128  ;;  %p252_p4 = scmp.lt.s32.totalorder %s17_s10, %s17_s10 }
   0xb   :  { %p248_p3 = scmp.ne.s32.totalorder %s17_s10, %s247_s20  ;;  %p253_p5 = scmp.lt.s32.totalorder %s247_s20, %s247_s20 }
   0xd   :  { %p254_p6 = por %p253_p5, %p252_p4 }
   0xf   :  { %p255_p7 = pnand %p254_p6, %p248_p3 }
  0x11   :  { %258 = shalt.err (!%p255_p7)
}
  0x12   :  { %19 = dma.hbm_to_vmem [thread:$0]  %s375_s0, 128, %s17_s10, [#allocation3]  }
  0x13   :  { %s259_s25 = scalar_lea.hbm %s376_s1, 2048 }
  0x14   :  { %p260_p8 = scmp.ne.s32.totalorder %s376_s1, %s259_s25  ;;  %p263_p9 = scmp.lt.u32.totalorder %s259_s25, %s376_s1 }
  0x16   :  { %p265_p10 = pnand %p263_p9, %p260_p8 }
  0x18   :  { %268 = shalt.err (!%p265_p10)
}
  0x19   :  { %s269_s30 = scalar_lea.vmem %s332_s12, 2048  ;;  %p274_p12 = scmp.lt.s32.totalorder %s332_s12, %s332_s12 }
  0x1a   :  { %p270_p11 = scmp.ne.s32.totalorder %s332_s12, %s269_s30  ;;  %p275_p13 = scmp.lt.s32.totalorder %s269_s30, %s269_s30 }
  0x1c   :  { %p276_p0 = por %p275_p13, %p274_p12 }
  0x1e   :  { %p277_p1 = pnand %p276_p0, %p270_p11 }
  0x20   :  { %280 = shalt.err (!%p277_p1)
}
  0x21   :  { %s311_s0 = smov 128   ;;  %s312_s3 = smov 8  }
  0x22   :  { %31 = dma.hbm_to_vmem [thread:$0]  %s376_s1, 2048, %s332_s12, [#allocation6], %s311_s0, %s311_s0, %s312_s3  }
  0x23   :  { %303 = dma.done.wait [#allocation3], 128  }
  0x24   :  { %304 = vsyncadd [#allocation3], 4294967168 }
  0x25   :  { %305 = dma.done.wait [#allocation6], 2048  }
  0x26   :  { %306 = vsyncadd [#allocation6], 4294965248  ;;  %v313_v0 = vmov 0.0|0.0   ;;  %vm314_vm0 = vmmov 0   ;;  %v315_v1 = vmov 0.0   ;;  %v39_v2 = vld [vmem:[#allocation5] sm:$0xff] }
  0x27   :  { %205 = vmatprep.subr.bf16.mxu0 %v313_v0  ;;  %202 = vmatprep.mubr.msk.f32.mxu0 %vm314_vm0, %v315_v1  ;;  %v40_v3 = vld [vmem:[#allocation5 + $0x8] sm:$0xff]  ;;  %v41_v4 = vld [vmem:[#allocation5 + $0x10] sm:$0xff]  ;;  %v42_v6 = vld [vmem:[#allocation5 + $0x18] sm:$0xff]  ;;  %s316_s1 = smov [#allocation7]  }
  0x28   :  { %v206_v5 = vpack.c.bf16 %v40_v3, %v39_v2  ;;  %v209_v7 = vpack.c.bf16 %v42_v6, %v41_v4  ;;  %v43_v8 = vld [vmem:[#allocation5 + $0x20] sm:$0xff]  ;;  %v44_v9 = vld [vmem:[#allocation5 + $0x28] sm:$0xff]  ;;  %v45_v11 = vld [vmem:[#allocation5 + $0x30] sm:$0xff]  ;;  %s143_s6 = sshll.u32 %s316_s1, 4  ;;  %s144_s6 = int_to_ptr.vmem [resolvable:$true] %s143_s6 }
  0x29   :  { %v212_v10 = vpack.c.bf16 %v44_v9, %v43_v8  ;;  %v46_v12 = vld [vmem:[#allocation5 + $0x38] sm:$0xff]  ;;  %v47_v14 = vld [vmem:[#allocation5 + $0x40] sm:$0xff]  ;;  %v48_v15 = vld [vmem:[#allocation5 + $0x48] sm:$0xff]  ;;  %s281_s7 = scalar_lea.vmem %s144_s6, 128  ;;  %p286_p3 = scmp.lt.s32.totalorder %s144_s6, %s144_s6 }
  0x2a   :  { %207 = vmatpush3.bf16.msra.mxu0 %v206_v5  ;;  %v215_v13 = vpack.c.bf16 %v46_v12, %v45_v11  ;;  %v218_v16 = vpack.c.bf16 %v48_v15, %v47_v14  ;;  %v49_v17 = vld [vmem:[#allocation5 + $0x50] sm:$0xff]  ;;  %v50_v18 = vld [vmem:[#allocation5 + $0x58] sm:$0xff]  ;;  %v51_v20 = vld [vmem:[#allocation5 + $0x60] sm:$0xff]  ;;  %p282_p2 = scmp.ne.s32.totalorder %s144_s6, %s281_s7  ;;  %p287_p4 = scmp.lt.s32.totalorder %s281_s7, %s281_s7 }
  0x2b   :  { %208 = vmatprep.subr.bf16.mxu0 %v313_v0  ;;  %v221_v19 = vpack.c.bf16 %v50_v18, %v49_v17  ;;  %v52_v21 = vld [vmem:[#allocation5 + $0x68] sm:$0xff]  ;;  %v53_v23 = vld [vmem:[#allocation5 + $0x70] sm:$0xff]  ;;  %v54_v24 = vld [vmem:[#allocation5 + $0x78] sm:$0xff] }
  0x2c   :  { %v224_v22 = vpack.c.bf16 %v52_v21, %v51_v20  ;;  %v227_v25 = vpack.c.bf16 %v54_v24, %v53_v23  ;;  %v38_v26 = vld [vmem:[#allocation2] sm:$0xff]  ;;  %p288_p5 = por %p287_p4, %p286_p3 }
  0x2e   :  { %210 = vmatpush3.bf16.msra.mxu0 %v209_v7  ;;  %p289_p6 = pnand %p288_p5, %p282_p2 }
  0x2f   :  { %211 = vmatprep.subr.bf16.mxu0 %v313_v0 }
  0x32   :  { %213 = vmatpush3.bf16.msra.mxu0 %v212_v10 }
  0x33   :  { %214 = vmatprep.subr.bf16.mxu0 %v313_v0 }
  0x36   :  { %216 = vmatpush3.bf16.msra.mxu0 %v215_v13 }
  0x37   :  { %217 = vmatprep.subr.bf16.mxu0 %v313_v0 }
  0x3a   :  { %219 = vmatpush3.bf16.msra.mxu0 %v218_v16 }
  0x3b   :  { %220 = vmatprep.subr.bf16.mxu0 %v313_v0 }
  0x3e   :  { %222 = vmatpush3.bf16.msra.mxu0 %v221_v19 }
  0x3f   :  { %223 = vmatprep.subr.bf16.mxu0 %v313_v0 }
  0x42   :  { %225 = vmatpush3.bf16.msra.mxu0 %v224_v22 }
  0x43   :  { %226 = vmatprep.subr.bf16.mxu0 %v313_v0 }
  0x46   :  { %228 = vmatpush3.bf16.msra.mxu0 %v227_v25 }
  0x49   :  { %203 = vmatmul.mubr.f32.vlgmr.msra.gmra.mrb[0].mxu0 %v38_v26 }
 0x11c   :  { %v121_v27 = vpop.f32.mrb[0].mxu0 }
 0x11d   :  { %129 = vst [vmem:[#allocation7] sm:$0xff] %v121_v27  ;;  %v204_v28 = vpop.f32.mrb[1].mxu0 }
 0x11e   :  { %292 = shalt.err (!%p289_p6)
}
 0x11f   :  { %s293_s10 = scalar_lea.hbm %s377_s2, 128 }
 0x120   :  { %p294_p7 = scmp.ne.s32.totalorder %s377_s2, %s293_s10  ;;  %p297_p8 = scmp.lt.u32.totalorder %s293_s10, %s377_s2 }
 0x122   :  { %p299_p9 = pnand %p297_p8, %p294_p7 }
 0x124   :  { %302 = shalt.err (!%p299_p9)
}
 0x125   :  { %146 = dma.vmem_to_hbm [thread:$0]  %s144_s6, 128, %s377_s2, [#allocation4]  }
 0x126   :  { %307 = dma.done.wait [#allocation4], 128  }
 0x127   :  { %308 = vsyncadd [#allocation4], 4294967168 }
 0x128   :  { %150 = vsyncpa [#allocation3], 1 }
 0x129   :  { %151 = vsyncpa [#allocation6], 1 }
 0x12a   :  { %152 = vsyncpa [#allocation4], 1 }

</bundles_post_ra>
